<compile_context>
chip_gen: v6e
topology: v6e:2x2x1
jax: 0.10.0
libtpu: 0.0.40
codegen_flags: <defaults>
</compile_context>

<pallas_src>
import jax
import jax.numpy as jnp
import numpy as np
from jax import lax
from jax.experimental import pallas as pl
from jax.experimental.pallas import tpu as pltpu


def _round_up(x, m):
    return ((x + m - 1) // m) * m


# ---------------------------------------------------------------------------
# Fused CollapsibleLinearBlock kernel
#   inputs : patches (K*K*Cin, TP) bf16, w1 (Ctmp, K*K*Cin) bf16,
#            w2 (Cout, Ctmp) bf16, bias (Cout, 1) f32, [extra (Cout, TP) f32]
#   output : (Cout, TP) f32
# ---------------------------------------------------------------------------
def _make_block_kernel(relu, residual, has_extra, cin, center_row):
    def kernel(*refs):
        p_ref, w1_ref, w2_ref, b_ref = refs[:4]
        nxt = 4
        extra_ref = None
        if has_extra:
            extra_ref = refs[nxt]
            nxt += 1
        o_ref = refs[nxt]

        p = p_ref[...]                                        # (KKC, TP) bf16
        # expand conv: all K*K taps folded into one MXU matmul
        t = jnp.dot(w1_ref[...], p,
                    preferred_element_type=jnp.float32)       # (Ctmp, TP) f32
        # 1x1 squeeze conv
        y = jnp.dot(w2_ref[...], t.astype(jnp.bfloat16),
                    preferred_element_type=jnp.float32)       # (Cout, TP) f32
        y = y + b_ref[...]                                    # (Cout,1) bcast
        if residual:
            # residual input == center tap rows of the im2col tile
            y = y + p[center_row:center_row + cin, :].astype(jnp.float32)
        if relu:
            y = jnp.maximum(y, 0.0)
        if has_extra:
            # fused add_residual (post-activation, matching torch forward)
            y = y + extra_ref[...]
        o_ref[...] = y.astype(o_ref.dtype)

    return kernel


# ---------------------------------------------------------------------------
# im2col (plain-JAX glue): (C, N, H, W) -> (K*K*C, N*H*W)
# row index = (kh*K + kw)*C + c   (matches reshape of HWIO weights)
# ---------------------------------------------------------------------------
def _im2col(x_cnhw, K):
    C, N, H, W = x_cnhw.shape
    pad = (K - 1) // 2
    xp = jnp.pad(x_cnhw, ((0, 0), (0, 0), (pad, pad), (pad, pad)))
    taps = [xp[:, :, kh:kh + H, kw:kw + W]
            for kh in range(K) for kw in range(K)]
    return jnp.stack(taps, axis=0).reshape(K * K * C, N * H * W)


def collapsible_block(x_cnhw, w_exp, w_sq, b_sq, kernel_size, relu,
                      residual=False, extra=None, max_tile_pixels=1024):
    """One (Residual)CollapsibleLinearBlock, optionally with a fused post-add."""
    C, N, H, W = x_cnhw.shape
    K = kernel_size
    Ctmp = w_exp.shape[-1]
    Cout = w_sq.shape[-1]
    pad = (K - 1) // 2
    npix = N * H * W
    if residual:
        assert Cout == C, "residual block needs Cin == Cout"

    # Pixel tile: multiple of 128 lanes; pad the pixel axis so tiles divide it.
    tp = min(max_tile_pixels, _round_up(npix, 128))
    npad = _round_up(npix, tp)

    # im2col LHS in bf16 (MXU operand dtype); weights pre-transposed to bf16.
    patches = _im2col(x_cnhw, K).astype(jnp.bfloat16)            # (KKC, npix)
    if npad != npix:
        patches = jnp.pad(patches, ((0, 0), (0, npad - npix)))
    kkc = K * K * C
    w1 = jnp.transpose(w_exp.reshape(kkc, Ctmp)).astype(jnp.bfloat16)  # (Ctmp,KKC)
    w2 = jnp.transpose(w_sq).astype(jnp.bfloat16)                      # (Cout,Ctmp)
    b = b_sq.reshape(Cout, 1).astype(jnp.float32)

    inputs = [patches, w1, w2, b]
    in_specs = [
        pl.BlockSpec((kkc, tp), lambda i: (0, i)),      # pixel-tiled patches
        pl.BlockSpec((Ctmp, kkc), lambda i: (0, 0)),    # weights: VMEM-resident
        pl.BlockSpec((Cout, Ctmp), lambda i: (0, 0)),
        pl.BlockSpec((Cout, 1), lambda i: (0, 0)),
    ]
    if extra is not None:
        e = extra.reshape(Cout, npix).astype(jnp.float32)
        if npad != npix:
            e = jnp.pad(e, ((0, 0), (0, npad - npix)))
        inputs.append(e)
        in_specs.append(pl.BlockSpec((Cout, tp), lambda i: (0, i)))

    center_row = (pad * K + pad) * C
    kern = _make_block_kernel(relu, residual, extra is not None, C, center_row)

    out = pl.pallas_call(
        kern,
        out_shape=jax.ShapeDtypeStruct((Cout, npad), jnp.float32),
        grid=(npad // tp,),
        in_specs=in_specs,
        out_specs=pl.BlockSpec((Cout, tp), lambda i: (0, i)),
        compiler_params=pltpu.CompilerParams(
            dimension_semantics=("parallel",)),          # megacore on v7x
    )(*inputs)
    return out[:, :npix].reshape(Cout, N, H, W)


# ---------------------------------------------------------------------------
# PixelShuffle: (c*r*r, N, H, W) -> (N, c, H*r, W*r), torch semantics
# ---------------------------------------------------------------------------
def _pixel_shuffle_cnhw_to_nchw(x, r):
    C, N, H, W = x.shape
    c = C // (r * r)
    x = x.reshape(c, r, r, N, H, W)
    x = jnp.transpose(x, (3, 0, 4, 1, 5, 2))             # (N, c, H, r, W, r)
    return x.reshape(N, c, H * r, W * r)


# ---------------------------------------------------------------------------
# Parameter init (deterministic, shapes match the PyTorch module __init__)
# ---------------------------------------------------------------------------
def init_params(key, in_channels=3, out_channels=3, num_channels=16,
                num_lblocks=3, scaling_factor=2, tmp_channels=256):
    def make_block(k, K, cin, cout):
        k1, k2, k3 = jax.random.split(k, 3)
        return dict(
            K=K,
            w_exp=jax.random.normal(k1, (K, K, cin, tmp_channels), jnp.float32) * 0.05,
            w_sq=jax.random.normal(k2, (tmp_channels, cout), jnp.float32) * 0.05,
            b_sq=jax.random.normal(k3, (cout,), jnp.float32) * 0.05,
        )

    keys = jax.random.split(key, 2 + num_lblocks)
    return {
        'conv_first': make_block(keys[0], 5, in_channels, num_channels),
        'residual': [make_block(keys[1 + i], 3, num_channels, num_channels)
                     for i in range(num_lblocks)],
        'conv_last': make_block(keys[1 + num_lblocks], 5, num_channels,
                                out_channels * scaling_factor ** 2),
        'scaling_factor': scaling_factor,
    }


# ---------------------------------------------------------------------------
# Full SESR forward (non-collapsed training form, matching nn.Module.forward)
# ---------------------------------------------------------------------------
def sesr_forward(params, x_nchw, max_tile_pixels=1024):
    x = jnp.transpose(x_nchw.astype(jnp.float32), (1, 0, 2, 3))   # NCHW -> CNHW

    cf = params['conv_first']
    feats = collapsible_block(x, cf['w_exp'], cf['w_sq'], cf['b_sq'], cf['K'],
                              relu=True, max_tile_pixels=max_tile_pixels)

    r = feats
    nres = len(params['residual'])
    for bi, blk in enumerate(params['residual']):
        fuse_feats = feats if bi == nres - 1 else None   # fuse add_residual
        r = collapsible_block(r, blk['w_exp'], blk['w_sq'], blk['b_sq'],
                              blk['K'], relu=True, residual=True,
                              extra=fuse_feats, max_tile_pixels=max_tile_pixels)
    if nres == 0:                                        # degenerate config
        r = r + feats

    cl = params['conv_last']
    out = collapsible_block(r, cl['w_exp'], cl['w_sq'], cl['b_sq'], cl['K'],
                            relu=False, max_tile_pixels=max_tile_pixels)

    return _pixel_shuffle_cnhw_to_nchw(out, params['scaling_factor'])


# ---------------------------------------------------------------------------
# Pure-JAX reference (lax.conv, f32) for a correctness smoke test
# ---------------------------------------------------------------------------
def _conv_ref(x_nchw, w_hwio, pad):
    return lax.conv_general_dilated(
        x_nchw, w_hwio, window_strides=(1, 1),
        padding=[(pad, pad), (pad, pad)],
        dimension_numbers=('NCHW', 'HWIO', 'NCHW'))


def _block_ref(x, blk, relu, residual=False):
    K = blk['K']
    pad = (K - 1) // 2
    t = _conv_ref(x, blk['w_exp'], pad)
    Ctmp, Cout = blk['w_sq'].shape
    y = _conv_ref(t, blk['w_sq'].reshape(1, 1, Ctmp, Cout), 0)
    y = y + blk['b_sq'].reshape(1, Cout, 1, 1)
    if residual:
        y = x + y
    if relu:
        y = jnp.maximum(y, 0.0)
    return y


def sesr_ref(params, x_nchw):
    x = x_nchw.astype(jnp.float32)
    feats = _block_ref(x, params['conv_first'], relu=True)
    r = feats
    for blk in params['residual']:
        r = _block_ref(r, blk, relu=True, residual=True)
    r = r + feats
    out = _block_ref(r, params['conv_last'], relu=False)
    sf = params['scaling_factor']
    N, C, H, W = out.shape
    c = C // (sf * sf)
    out = out.reshape(N, c, sf, sf, H, W)
    return jnp.transpose(out, (0, 1, 4, 2, 5, 3)).reshape(N, c, H * sf, W * sf)


if __name__ == "__main__":
    key = jax.random.PRNGKey(0)
    pkey, xkey = jax.random.split(key)

    params = init_params(pkey)                                   # sesr() defaults
    x = jax.random.normal(xkey, (2, 3, 16, 16), jnp.float32)     # NCHW input

    out = jax.block_until_ready(sesr_forward(params, x))
    assert out.shape == (2, 3, 32, 32), out.shape                # PixelShuffle(2)

    # also exercise the multi-step grid path (4 pixel tiles, weights resident)
    out_tiled = jax.block_until_ready(sesr_forward(params, x, max_tile_pixels=128))

    ref = jax.block_until_ready(sesr_ref(params, x))
    np.testing.assert_allclose(np.asarray(out), np.asarray(ref),
                               rtol=3e-2, atol=3e-2)
    np.testing.assert_allclose(np.asarray(out_tiled), np.asarray(ref),
                               rtol=3e-2, atol=3e-2)

    print("KERNEL_OK")
</pallas_src>

<mosaic_0001>
module attributes {stable_mosaic.version = 11 : i64} {
  func.func @kernel(%arg0: i32, %arg1: memref<75x512xbf16, #tpu.memory_space<vmem>>, %arg2: memref<256x75xbf16, #tpu.memory_space<vmem>>, %arg3: memref<16x256xbf16, #tpu.memory_space<vmem>>, %arg4: memref<16x1xf32, #tpu.memory_space<vmem>>, %arg5: memref<16x512xf32, #tpu.memory_space<vmem>>) attributes {dimension_semantics = [#tpu.dimension_semantics<parallel>], iteration_bounds = array<i64: 1>, scalar_prefetch = 0 : i64, scratch_operands = 0 : i64, tpu.core_type = #tpu.core_type<tc>, window_params = [{transform_indices = @transform_0, window_bounds = array<i64: 75, 512>}, {pipeline_mode = #tpu.pipeline_mode<synchronous>, transform_indices = @transform_1, window_bounds = array<i64: 256, 75>}, {pipeline_mode = #tpu.pipeline_mode<synchronous>, transform_indices = @transform_2, window_bounds = array<i64: 16, 256>}, {pipeline_mode = #tpu.pipeline_mode<synchronous>, transform_indices = @transform_3, window_bounds = array<i64: 16, 1>}, {transform_indices = @transform_4, window_bounds = array<i64: 16, 512>}]} {
    %c0 = arith.constant 0 : index
    %c0_0 = arith.constant 0 : index
    %0 = vector.load %arg1[%c0, %c0_0] : memref<75x512xbf16, #tpu.memory_space<vmem>>, vector<75x512xbf16>
    %c0_1 = arith.constant 0 : index
    %c0_2 = arith.constant 0 : index
    %1 = vector.load %arg2[%c0_1, %c0_2] : memref<256x75xbf16, #tpu.memory_space<vmem>>, vector<256x75xbf16>
    %cst = arith.constant dense<0.000000e+00> : vector<256x512xf32>
    %2 = tpu.matmul %1, %0, %cst {dimension_numbers = #tpu.dot_dimension_numbers<[1], [0], [0], [1], [0, 0, 1, 1], [], []>} : vector<256x75xbf16>, vector<75x512xbf16>, vector<256x512xf32> -> vector<256x512xf32>
    %c0_3 = arith.constant 0 : index
    %c0_4 = arith.constant 0 : index
    %3 = vector.load %arg3[%c0_3, %c0_4] : memref<16x256xbf16, #tpu.memory_space<vmem>>, vector<16x256xbf16>
    %4 = arith.truncf %2 : vector<256x512xf32> to vector<256x512xbf16>
    %cst_5 = arith.constant dense<0.000000e+00> : vector<16x512xf32>
    %5 = tpu.matmul %3, %4, %cst_5 {dimension_numbers = #tpu.dot_dimension_numbers<[1], [0], [0], [1], [0, 0, 1, 1], [], []>} : vector<16x256xbf16>, vector<256x512xbf16>, vector<16x512xf32> -> vector<16x512xf32>
    %c0_6 = arith.constant 0 : index
    %c0_7 = arith.constant 0 : index
    %6 = vector.load %arg4[%c0_6, %c0_7] : memref<16x1xf32, #tpu.memory_space<vmem>>, vector<16x1xf32>
    %7 = vector.broadcast %6 : vector<16x1xf32> to vector<16x512xf32>
    %8 = arith.addf %5, %7 : vector<16x512xf32>
    %cst_8 = arith.constant 0.000000e+00 : f32
    %9 = vector.broadcast %cst_8 : f32 to vector<16x512xf32>
    %10 = arith.maximumf %8, %9 : vector<16x512xf32>
    %c0_9 = arith.constant 0 : index
    %c0_10 = arith.constant 0 : index
    %11 = vector.load %arg5[%c0_9, %c0_10] : memref<16x512xf32, #tpu.memory_space<vmem>>, vector<16x512xf32>
    tpu.vector_store %arg5[%c0_9, %c0_10], %10 {strides = array<i32>} : memref<16x512xf32, #tpu.memory_space<vmem>>, vector<16x512xf32>,
    return
  }
  func.func @transform_0(%arg0: i32) -> (i32, i32) {
    %c0_i32 = arith.constant 0 : i32
    %c0_i32_0 = arith.constant 0 : i32
    return %c0_i32, %arg0 : i32, i32
  }
  func.func @transform_1(%arg0: i32) -> (i32, i32) {
    %c0_i32 = arith.constant 0 : i32
    %c0_i32_0 = arith.constant 0 : i32
    %c0_i32_1 = arith.constant 0 : i32
    return %c0_i32, %c0_i32_0 : i32, i32
  }
  func.func @transform_2(%arg0: i32) -> (i32, i32) {
    %c0_i32 = arith.constant 0 : i32
    %c0_i32_0 = arith.constant 0 : i32
    %c0_i32_1 = arith.constant 0 : i32
    return %c0_i32, %c0_i32_0 : i32, i32
  }
  func.func @transform_3(%arg0: i32) -> (i32, i32) {
    %c0_i32 = arith.constant 0 : i32
    %c0_i32_0 = arith.constant 0 : i32
    %c0_i32_1 = arith.constant 0 : i32
    return %c0_i32, %c0_i32_0 : i32, i32
  }
  func.func @transform_4(%arg0: i32) -> (i32, i32) {
    %c0_i32 = arith.constant 0 : i32
    %c0_i32_0 = arith.constant 0 : i32
    return %c0_i32, %arg0 : i32, i32
  }
}

</mosaic_0001>

<bundles_post_ra>
// kernel: tpu_custom_call.1
= control target key start
LH: loop header
LB: loop body
LE: loop exit
PB: predicated region body
PF: predicated region fallthrough
CT: control target
= control target key end

     0   :  { %vm296_vm0 = vcmask 1044480   ;;  %vm297_vm1 = vcmask 1045504   ;;  %v1051_v1 = vmov 65535   ;;  %v1052_v12 = vmov 0   ;;  %s1545_s0 = inlined_call_operand.vmem [shape: bf16[75,512], index: 0, kind: input, shape index: {}]   ;;  %s1546_s1 = inlined_call_operand.vmem [shape: bf16[256,75], index: 1, kind: input, shape index: {}]   ;;  %s1547_s2 = inlined_call_operand.vmem [shape: bf16[16,256], index: 2, kind: input, shape index: {}]   ;;  %s1548_s3 = inlined_call_operand.vmem [shape: f32[16,1], index: 3, kind: input, shape index: {}]   ;;  %s1549_s4 = inlined_call_operand.hbm [shape: f32[16,512], index: 4, kind: output, shape index: {}]  }
   0x1   :  { %v980_v0 = vld [vmem:[%s1545_s0 + $0x84] ss:$16 sps:$4 sm:$0x3f]   ;;  %v298_v2 = vsel %vm296_vm0, 4294967295, %v1051_v1  ;;  %v988_v11 = vld [vmem:[%s1545_s0 + $0x6c] ss:$16 sps:$4 sm:$0xff]   ;;  %344 = vmatprep.mubr.bf16.mxu0 %v1052_v12  ;;  %537 = vmatprep.mubr.bf16.mxu1 %v1052_v12 }
   0x2   :  { %v982_v3 = vld [vmem:[%s1545_s0 + $0x8c] ss:$16 sps:$4 sm:$0x3f]   ;;  %v299_v4 = vsel %vm297_vm1, %v298_v2, 0  ;;  %v986_v6 = vld [vmem:[%s1545_s0 + $0x64] ss:$16 sps:$4 sm:$0xff]   ;;  %979 = vset.pattern.permute.xlu0 %v1052_v12 }
   0x3   :  { %v984_v5 = vld [vmem:[%s1545_s0 + $0x80] ss:$16 sps:$4 sm:$0x3f]   ;;  %v304_v7 = vand.u32 %v980_v0, %v299_v4  ;;  %v310_v8 = vand.u32 %v982_v3, %v299_v4  ;;  %v985_v9 = vld [vmem:[%s1545_s0 + $0x88] ss:$16 sps:$4 sm:$0x3f]  }
   0x4   :  { %v301_v10 = vand.u32 %v984_v5, %v299_v4  ;;  %v307_v13 = vand.u32 %v985_v9, %v299_v4  ;;  %v990_v14 = vld [vmem:[%s1545_s0 + $0x60] ss:$16 sps:$4 sm:$0xff]   ;;  %v991_v15 = vld [vmem:[%s1545_s0 + $0x68] ss:$16 sps:$4 sm:$0xff]   ;;  %v992_v16 = vld [vmem:[%s1545_s0 + $0x44] ss:$16 sps:$4 sm:$0xff]  }
   0x5   :  { %318 = vmatprep.subr.bf16.mxu0 %v304_v7  ;;  %511 = vmatprep.subr.bf16.mxu1 %v310_v8  ;;  %v994_v17 = vld [vmem:[%s1545_s0 + $0x4c] ss:$16 sps:$4 sm:$0xff]   ;;  %v996_v18 = vld [vmem:[%s1545_s0 + $0x40] ss:$16 sps:$4 sm:$0xff]   ;;  %v997_v19 = vld [vmem:[%s1545_s0 + $0x48] ss:$16 sps:$4 sm:$0xff]  }
   0x6   :  { %319 = vmatpush1.bf16.msra.mxu0 %v301_v10  ;;  %512 = vmatpush1.bf16.msra.mxu1 %v307_v13  ;;  %v998_v20 = vld [vmem:[%s1545_s0 + $0x24] ss:$16 sps:$4 sm:$0xff]   ;;  %v1000_v21 = vld [vmem:[%s1545_s0 + $0x2c] ss:$16 sps:$4 sm:$0xff]   ;;  %v1002_v22 = vld [vmem:[%s1545_s0 + $0x20] ss:$16 sps:$4 sm:$0xff]  }
   0x7   :  { %320 = vmatprep.subr.bf16.mxu0 %v986_v6  ;;  %513 = vmatprep.subr.bf16.mxu1 %v988_v11  ;;  %v1003_v23 = vld [vmem:[%s1545_s0 + $0x28] ss:$16 sps:$4 sm:$0xff]   ;;  %v1004_v24 = vld [vmem:[%s1545_s0 + $0x4] ss:$16 sps:$4 sm:$0xff]   ;;  %v1006_v25 = vld [vmem:[%s1545_s0 + $0xc] ss:$16 sps:$4 sm:$0xff]  }
   0x8   :  { %v1008_v26 = vld [vmem:[%s1545_s0] ss:$16 sps:$4 sm:$0xff]   ;;  %v1009_v27 = vld [vmem:[%s1545_s0 + $0x8] ss:$16 sps:$4 sm:$0xff]   ;;  %vm247_vm2 = vcmask 613376  }
   0x9   :  { %v1010_v28 = vld [vmem:[%s1546_s1] sm:$0xff]   ;;  %v1011_v29 = vld [vmem:[%s1546_s1 + $0x8] sm:$0xff]  }
   0xa   :  { %321 = vmatpush1.bf16.msra.mxu0 %v990_v14  ;;  %514 = vmatpush1.bf16.msra.mxu1 %v991_v15 }
   0xb   :  { %322 = vmatprep.subr.bf16.mxu0 %v992_v16  ;;  %515 = vmatprep.subr.bf16.mxu1 %v994_v17 }
   0xe   :  { %323 = vmatpush1.bf16.msra.mxu0 %v996_v18  ;;  %516 = vmatpush1.bf16.msra.mxu1 %v997_v19 }
   0xf   :  { %324 = vmatprep.subr.bf16.mxu0 %v998_v20  ;;  %517 = vmatprep.subr.bf16.mxu1 %v1000_v21 }
  0x12   :  { %325 = vmatpush1.bf16.msra.mxu0 %v1002_v22  ;;  %518 = vmatpush1.bf16.msra.mxu1 %v1003_v23 }
  0x13   :  { %326 = vmatprep.subr.bf16.mxu0 %v1004_v24  ;;  %519 = vmatprep.subr.bf16.mxu1 %v1006_v25 }
  0x16   :  { %327 = vmatpush1.bf16.msra.mxu0 %v1008_v26  ;;  %520 = vmatpush1.bf16.msra.mxu1 %v1009_v27 }
  0x19   :  { %940 = vmatmul.mubr.msk.bf16.vlgmr.msra.gmra.mxu0 %vm247_vm2, %v1010_v28  ;;  %956 = vmatmul.mubr.msk.bf16.vlgmr.msra.gmra.mxu1 %vm247_vm2, %v1010_v28 }
  0x1a   :  { %354 = vmatprep.mubr.bf16.mxu0 %v1052_v12  ;;  %547 = vmatprep.mubr.bf16.mxu1 %v1052_v12 }
  0x1b   :  { %9 = vsyncpa [#allocation3], 0  ;;  %v1012_v30 = vld [vmem:[%s1546_s1 + $0x10] sm:$0xff]   ;;  %v1013_v31 = vld [vmem:[%s1546_s1 + $0x18] sm:$0xff]  }
  0x1c   :  { %v1014_v32 = vld [vmem:[%s1546_s1 + $0x20] sm:$0xff]   ;;  %v1015_v33 = vld [vmem:[%s1546_s1 + $0x28] sm:$0xff]   ;;  %v1016_v34 = vld [vmem:[%s1546_s1 + $0x30] sm:$0xff]  }
  0x1d   :  { %v1017_v35 = vld [vmem:[%s1546_s1 + $0x38] sm:$0xff]   ;;  %v1018_v36 = vld [vmem:[%s1546_s1 + $0x40] sm:$0xff]   ;;  %v1019_v37 = vld [vmem:[%s1546_s1 + $0x48] sm:$0xff]  }
  0x1e   :  { %v1020_v38 = vld [vmem:[%s1546_s1 + $0x50] sm:$0xff]   ;;  %v1021_v39 = vld [vmem:[%s1546_s1 + $0x58] sm:$0xff]   ;;  %v1022_v40 = vld [vmem:[%s1546_s1 + $0x60] sm:$0xff]  }
  0x1f   :  { %v1023_v41 = vld [vmem:[%s1546_s1 + $0x68] sm:$0xff]   ;;  %v1024_v42 = vld [vmem:[%s1546_s1 + $0x70] sm:$0xff]   ;;  %v1025_v43 = vld [vmem:[%s1546_s1 + $0x78] sm:$0xff]  }
  0x20   :  { %v1028_v20 = vld [vmem:[%s1547_s2 + $0x4] ss:$8 sps:$4 sm:$0xff]  }
  0x21   :  { %941 = vmatmul.mubr.msk.bf16.gmra.mxu0 %vm247_vm2, %v1011_v29  ;;  %957 = vmatmul.mubr.msk.bf16.gmra.mxu1 %vm247_vm2, %v1011_v29  ;;  %v764_v24 = vld [vmem:[%s1548_s3] sm:$0xff]  ;;  %v765_v27 = vld [vmem:[%s1548_s3 + $0x8] sm:$0xff] }
  0x22   :  { %364 = vmatprep.mubr.bf16.mxu0 %v1052_v12  ;;  %557 = vmatprep.mubr.bf16.mxu1 %v1052_v12 }
  0x23   :  { %768 = vperm.xlu0 %979, %v764_v24  }
  0x27   :  { %773 = vperm.xlu0 %979, %v765_v27  }
  0x29   :  { %942 = vmatmul.mubr.msk.bf16.gmra.mxu0 %vm247_vm2, %v1012_v30  ;;  %958 = vmatmul.mubr.msk.bf16.gmra.mxu1 %vm247_vm2, %v1012_v30 }
  0x2a   :  { %374 = vmatprep.mubr.bf16.mxu0 %v1052_v12  ;;  %567 = vmatprep.mubr.bf16.mxu1 %v1052_v12 }
  0x31   :  { %943 = vmatmul.mubr.msk.bf16.gmra.mxu0 %vm247_vm2, %v1013_v31  ;;  %959 = vmatmul.mubr.msk.bf16.gmra.mxu1 %vm247_vm2, %v1013_v31 }
  0x32   :  { %384 = vmatprep.mubr.bf16.mxu0 %v1052_v12  ;;  %577 = vmatprep.mubr.bf16.mxu1 %v1052_v12 }
  0x39   :  { %944 = vmatmul.mubr.msk.bf16.gmra.mxu0 %vm247_vm2, %v1014_v32  ;;  %960 = vmatmul.mubr.msk.bf16.gmra.mxu1 %vm247_vm2, %v1014_v32 }
  0x3a   :  { %394 = vmatprep.mubr.bf16.mxu0 %v1052_v12  ;;  %587 = vmatprep.mubr.bf16.mxu1 %v1052_v12 }
  0x41   :  { %945 = vmatmul.mubr.msk.bf16.gmra.mxu0 %vm247_vm2, %v1015_v33  ;;  %961 = vmatmul.mubr.msk.bf16.gmra.mxu1 %vm247_vm2, %v1015_v33 }
  0x42   :  { %404 = vmatprep.mubr.bf16.mxu0 %v1052_v12  ;;  %597 = vmatprep.mubr.bf16.mxu1 %v1052_v12 }
  0x49   :  { %946 = vmatmul.mubr.msk.bf16.gmra.mxu0 %vm247_vm2, %v1016_v34  ;;  %962 = vmatmul.mubr.msk.bf16.gmra.mxu1 %vm247_vm2, %v1016_v34 }
  0x4a   :  { %414 = vmatprep.mubr.bf16.mxu0 %v1052_v12  ;;  %607 = vmatprep.mubr.bf16.mxu1 %v1052_v12 }
  0x51   :  { %947 = vmatmul.mubr.msk.bf16.gmra.mxu0 %vm247_vm2, %v1017_v35  ;;  %963 = vmatmul.mubr.msk.bf16.gmra.mxu1 %vm247_vm2, %v1017_v35 }
  0x52   :  { %424 = vmatprep.mubr.bf16.mxu0 %v1052_v12  ;;  %617 = vmatprep.mubr.bf16.mxu1 %v1052_v12 }
  0x59   :  { %948 = vmatmul.mubr.msk.bf16.gmra.mxu0 %vm247_vm2, %v1018_v36  ;;  %964 = vmatmul.mubr.msk.bf16.gmra.mxu1 %vm247_vm2, %v1018_v36 }
  0x5a   :  { %434 = vmatprep.mubr.bf16.mxu0 %v1052_v12  ;;  %627 = vmatprep.mubr.bf16.mxu1 %v1052_v12 }
  0x61   :  { %949 = vmatmul.mubr.msk.bf16.gmra.mxu0 %vm247_vm2, %v1019_v37  ;;  %965 = vmatmul.mubr.msk.bf16.gmra.mxu1 %vm247_vm2, %v1019_v37 }
  0x62   :  { %444 = vmatprep.mubr.bf16.mxu0 %v1052_v12  ;;  %637 = vmatprep.mubr.bf16.mxu1 %v1052_v12 }
  0x69   :  { %950 = vmatmul.mubr.msk.bf16.gmra.mxu0 %vm247_vm2, %v1020_v38  ;;  %966 = vmatmul.mubr.msk.bf16.gmra.mxu1 %vm247_vm2, %v1020_v38 }
  0x6a   :  { %454 = vmatprep.mubr.bf16.mxu0 %v1052_v12  ;;  %647 = vmatprep.mubr.bf16.mxu1 %v1052_v12 }
  0x71   :  { %951 = vmatmul.mubr.msk.bf16.gmra.mxu0 %vm247_vm2, %v1021_v39  ;;  %967 = vmatmul.mubr.msk.bf16.gmra.mxu1 %vm247_vm2, %v1021_v39 }
  0x72   :  { %464 = vmatprep.mubr.bf16.mxu0 %v1052_v12  ;;  %657 = vmatprep.mubr.bf16.mxu1 %v1052_v12 }
  0x79   :  { %952 = vmatmul.mubr.msk.bf16.gmra.mxu0 %vm247_vm2, %v1022_v40  ;;  %968 = vmatmul.mubr.msk.bf16.gmra.mxu1 %vm247_vm2, %v1022_v40 }
  0x7a   :  { %474 = vmatprep.mubr.bf16.mxu0 %v1052_v12  ;;  %667 = vmatprep.mubr.bf16.mxu1 %v1052_v12 }
  0x81   :  { %953 = vmatmul.mubr.msk.bf16.gmra.mxu0 %vm247_vm2, %v1023_v41  ;;  %969 = vmatmul.mubr.msk.bf16.gmra.mxu1 %vm247_vm2, %v1023_v41 }
  0x82   :  { %484 = vmatprep.mubr.bf16.mxu0 %v1052_v12  ;;  %677 = vmatprep.mubr.bf16.mxu1 %v1052_v12 }
  0x89   :  { %954 = vmatmul.mubr.msk.bf16.gmra.mxu0 %vm247_vm2, %v1024_v42  ;;  %970 = vmatmul.mubr.msk.bf16.gmra.mxu1 %vm247_vm2, %v1024_v42 }
  0x8a   :  { %494 = vmatprep.mubr.bf16.mxu0 %v1052_v12  ;;  %687 = vmatprep.mubr.bf16.mxu1 %v1052_v12 }
  0x91   :  { %955 = vmatmul.mubr.msk.bf16.gmra.mxu0 %vm247_vm2, %v1025_v43  ;;  %971 = vmatmul.mubr.msk.bf16.gmra.mxu1 %vm247_vm2, %v1025_v43 }
  0x92   :  { %818 = vmatprep.mubr.bf16.mxu0 %v1028_v20  ;;  %861 = vmatprep.mubr.bf16.mxu1 %v1028_v20 }
  0xd9   :  { %v1254_v44 = vpop.f32.mrf.mxu0  ;;  %v1256_v45 = vpop.f32.mrf.mxu1 }
  0xda   :  { %1570 = vst [vmem:[#allocation5_spill] sm:$0xff] %v1254_v44  ;;  %1571 = vst [vmem:[#allocation6_spill] sm:$0xff] %v1256_v45 }
  0xdb   :  { %v1258_v46 = vpop.f32.mrf.mxu0  ;;  %v1260_v47 = vpop.f32.mrf.mxu1 }
  0xdc   :  { %1572 = vst [vmem:[#allocation7_spill] sm:$0xff] %v1258_v46  ;;  %1573 = vst [vmem:[#allocation8_spill] sm:$0xff] %v1260_v47 }
  0xdd   :  { %v1262_v48 = vpop.f32.mrf.mxu0  ;;  %v1266_v50 = vpop.f32.mrf.mxu1 }
  0xde   :  { %1574 = vst [vmem:[#allocation9_spill] sm:$0xff] %v1262_v48  ;;  %1575 = vst [vmem:[#allocation10_spill] sm:$0xff] %v1266_v50 }
  0xdf   :  { %v1270_v52 = vpop.f32.mrf.mxu0  ;;  %v1274_v54 = vpop.f32.mrf.mxu1 }
  0xe0   :  { %1576 = vst [vmem:[#allocation11_spill] sm:$0xff] %v1270_v52  ;;  %1577 = vst [vmem:[#allocation12_spill] sm:$0xff] %v1274_v54 }
  0xe1   :  { %v1278_v56 = vpop.f32.mrf.mxu0  ;;  %v1280_v57 = vpop.f32.mrf.mxu1 }
  0xe2   :  { %1578 = vst [vmem:[#allocation13_spill] sm:$0xff] %v1280_v57 }
  0xe3   :  { %v1282_v58 = vpop.f32.mrf.mxu0  ;;  %v1284_v59 = vpop.f32.mrf.mxu1 }
  0xe5   :  { %v1286_v60 = vpop.f32.mrf.mxu0  ;;  %v1290_v62 = vpop.f32.mrf.mxu1 }
  0xe6   :  { %1579 = vst [vmem:[#allocation14_spill] sm:$0xff] %v1290_v62 }
  0xe7   :  { %v1294_v0 = vpop.f32.mrf.mxu0  ;;  %v1298_v2 = vpop.f32.mrf.mxu1 }
  0xe9   :  { %v1302_v4 = vpop.f32.mrf.mxu0  ;;  %v1304_v5 = vpop.f32.mrf.mxu1 }
  0xeb   :  { %v1306_v6 = vpop.f32.mrf.mxu0  ;;  %v1308_v7 = vpop.f32.mrf.mxu1 }
  0xed   :  { %v1310_v8 = vpop.f32.mrf.mxu0  ;;  %v1312_v9 = vpop.f32.mrf.mxu1 }
  0xef   :  { %v1314_v10 = vpop.f32.mrf.mxu0  ;;  %v1316_v11 = vpop.f32.mrf.mxu1 }
  0xf1   :  { %v1318_v12 = vpop.f32.mrf.mxu0  ;;  %v1320_v13 = vpop.f32.mrf.mxu1 }
  0xf3   :  { %v1322_v14 = vpop.f32.mrf.mxu0  ;;  %v1324_v15 = vpop.f32.mrf.mxu1 }
  0xf5   :  { %v1326_v16 = vpop.f32.mrf.mxu0  ;;  %v1328_v17 = vpop.f32.mrf.mxu1 }
  0xf7   :  { %v1330_v18 = vpop.f32.mrf.mxu0  ;;  %v1332_v19 = vpop.f32.mrf.mxu1 }
  0xf9   :  { %v1337_v21 = vpop.f32.mrf.mxu0  ;;  %v1339_v22 = vpop.f32.mrf.mxu1 }
  0xfb   :  { %v1341_v23 = vpop.f32.mrf.mxu0  ;;  %v1346_v25 = vpop.f32.mrf.mxu1 }
  0xfd   :  { %v1348_v26 = vpop.f32.mrf.mxu0  ;;  %v1353_v28 = vpop.f32.mrf.mxu1 }
  0xff   :  { %v1355_v29 = vpop.f32.mrf.mxu0  ;;  %v1357_v30 = vpop.f32.mrf.mxu1 }
 0x101   :  { %v1359_v31 = vpop.f32.mrf.mxu0  ;;  %v1361_v32 = vpop.f32.mrf.mxu1 }
 0x103   :  { %v398_v33 = vpop.f32.mrf.mxu0  ;;  %v591_v34 = vpop.f32.mrf.mxu1 }
 0x105   :  { %v400_v35 = vpop.f32.mrf.mxu0  ;;  %v593_v36 = vpop.f32.mrf.mxu1 }
 0x107   :  { %v402_v37 = vpop.f32.mrf.mxu0  ;;  %v595_v38 = vpop.f32.mrf.mxu1 }
 0x109   :  { %v406_v39 = vpop.f32.mrf.mxu0  ;;  %v599_v40 = vpop.f32.mrf.mxu1 }
 0x10b   :  { %v408_v41 = vpop.f32.mrf.mxu0  ;;  %v601_v42 = vpop.f32.mrf.mxu1 }
 0x10d   :  { %v410_v43 = vpop.f32.mrf.mxu0  ;;  %v603_v20 = vpop.f32.mrf.mxu1 }
 0x10f   :  { %v412_v24 = vpop.f32.mrf.mxu0  ;;  %v605_v51 = vpop.f32.mrf.mxu1 }
 0x110   :  { %v725_v47 = vpack.c.bf16 %v412_v24, %v408_v41  ;;  %v727_v52 = vpack.c.bf16 %v605_v51, %v601_v42  ;;  %v723_v51 = vpack.c.bf16 %v595_v38, %v591_v34  ;;  %v722_v34 = vpack.c.bf16 %v593_v36, %v1361_v32 }
 0x111   :  { %v416_v49 = vpop.f32.mrf.mxu0  ;;  %v609_v27 = vpop.f32.mrf.mxu1  ;;  %v719_v38 = vpack.c.bf16 %v1357_v30, %v1346_v25  ;;  %v715_v32 = vpack.c.bf16 %v1332_v19, %v1324_v15  ;;  %v709_v19 = vpack.c.bf16 %v1314_v10, %v1306_v6  ;;  %v714_v36 = vpack.c.bf16 %v1328_v17, %v1320_v13 }
 0x112   :  { %v711_v42 = vpack.c.bf16 %v1316_v11, %v1308_v7  ;;  %v710_v10 = vpack.c.bf16 %v1312_v9, %v1304_v5  ;;  %v1590_v11 = vpack.c.bf16 %v1294_v0, %v1282_v58  ;;  %v1592_v9 = vpack.c.bf16 %v1286_v60, %v1278_v56  ;;  %v1596_v0 = vld [vmem:[#allocation11_spill] sm:$0xff]  ;;  %v1602_v60 = vld [vmem:[#allocation9_spill] sm:$0xff] }
 0x113   :  { %v418_v55 = vpop.f32.mrf.mxu0  ;;  %v611_v53 = vpop.f32.mrf.mxu1 }
 0x115   :  { %v420_v63 = vpop.f32.mrf.mxu0  ;;  %v613_v61 = vpop.f32.mrf.mxu1 }
 0x116   :  { %v728_v50 = vpack.c.bf16 %v420_v63, %v416_v49  ;;  %v730_v54 = vpack.c.bf16 %v613_v61, %v609_v27  ;;  %v1593_v27 = vld [vmem:[#allocation14_spill] sm:$0xff] }
 0x117   :  { %v422_v3 = vpop.f32.mrf.mxu0  ;;  %v615_v45 = vpop.f32.mrf.mxu1 }
 0x118   :  { %v729_v1 = vpack.c.bf16 %v422_v3, %v418_v55  ;;  %v731_v44 = vpack.c.bf16 %v615_v45, %v611_v53  ;;  %v724_v55 = vpack.c.bf16 %v410_v43, %v406_v39  ;;  %v721_v45 = vpack.c.bf16 %v402_v37, %v398_v33 }
 0x119   :  { %v1363_v48 = vpop.f32.mrf.mxu0  ;;  %v1365_v46 = vpop.f32.mrf.mxu1  ;;  %v726_v53 = vpack.c.bf16 %v603_v20, %v599_v40  ;;  %v717_v33 = vpack.c.bf16 %v1355_v29, %v1341_v23  ;;  %v713_v23 = vpack.c.bf16 %v1330_v18, %v1322_v14  ;;  %v718_v29 = vpack.c.bf16 %v1353_v28, %v1339_v22 }
 0x11a   :  { %1580 = vst [vmem:[#allocation15_spill] sm:$0xff] %v1363_v48  ;;  %1581 = vst [vmem:[#allocation16_spill] sm:$0xff] %v1365_v46  ;;  %786 = vmatprep.subr.bf16.mxu0 %v729_v1  ;;  %829 = vmatprep.subr.bf16.mxu1 %v731_v44  ;;  %v712_v22 = vpack.c.bf16 %v1326_v16, %v1318_v12  ;;  %v708_v16 = vpack.c.bf16 %v1310_v8, %v1302_v4 }
 0x11b   :  { %v1367_v57 = vpop.f32.mrf.mxu0  ;;  %787 = vmatpush1.bf16.msra.mxu0 %v728_v50  ;;  %v1369_v62 = vpop.f32.mrf.mxu1  ;;  %830 = vmatpush1.bf16.msra.mxu1 %v730_v54  ;;  %v720_v54 = vpack.c.bf16 %v400_v35, %v1359_v31  ;;  %v716_v35 = vpack.c.bf16 %v1348_v26, %v1337_v21  ;;  %v1591_v4 = vpack.c.bf16 %v1298_v2, %v1284_v59  ;;  %v1599_v2 = vld [vmem:[#allocation12_spill] sm:$0xff] }
 0x11c   :  { %1582 = vst [vmem:[#allocation17_spill] sm:$0xff] %v1367_v57  ;;  %1583 = vst [vmem:[#allocation18_spill] sm:$0xff] %v1369_v62  ;;  %788 = vmatprep.subr.bf16.mxu0 %v725_v47  ;;  %831 = vmatprep.subr.bf16.mxu1 %v727_v52 }
 0x11d   :  { %v1371_v49 = vpop.f32.mrf.mxu0  ;;  %v1375_v63 = vpop.f32.mrf.mxu1 }
 0x11e   :  { %1584 = vst [vmem:[#allocation19_spill] sm:$0xff] %v1371_v49  ;;  %1585 = vst [vmem:[#allocation20_spill] sm:$0xff] %v1375_v63 }
 0x11f   :  { %v1379_v50 = vpop.f32.mrf.mxu0  ;;  %789 = vmatpush1.bf16.msra.mxu0 %v724_v55  ;;  %v1383_v52 = vpop.f32.mrf.mxu1  ;;  %832 = vmatpush1.bf16.msra.mxu1 %v726_v53  ;;  %v1594_v55 = vld [vmem:[#allocation13_spill] sm:$0xff]  ;;  %v1600_v53 = vld [vmem:[#allocation8_spill] sm:$0xff] }
 0x120   :  { %1586 = vst [vmem:[#allocation21_spill] sm:$0xff] %v1379_v50  ;;  %1587 = vst [vmem:[#allocation22_spill] sm:$0xff] %v1383_v52  ;;  %790 = vmatprep.subr.bf16.mxu0 %v721_v45  ;;  %833 = vmatprep.subr.bf16.mxu1 %v723_v51  ;;  %v1595_v58 = vpack.c.bf16 %v1593_v27, %v1594_v55  ;;  %v1597_v45 = vld [vmem:[#allocation7_spill] sm:$0xff]  ;;  %v1601_v51 = vpack.c.bf16 %v1599_v2, %v1600_v53 }
 0x121   :  { %v1388_v3 = vpop.f32.mrf.mxu0  ;;  %v1393_v37 = vpop.f32.mrf.mxu1  ;;  %v1598_v59 = vpack.c.bf16 %v1596_v0, %v1597_v45 }
 0x122   :  { %1588 = vst [vmem:[#allocation23_spill] sm:$0xff] %v1393_v37 }
 0x123   :  { %v1397_v39 = vpop.f32.mrf.mxu0  ;;  %791 = vmatpush1.bf16.msra.mxu0 %v720_v54  ;;  %v1399_v31 = vpop.f32.mrf.mxu1  ;;  %834 = vmatpush1.bf16.msra.mxu1 %v722_v34  ;;  %v1603_v34 = vld [vmem:[#allocation5_spill] sm:$0xff] }
 0x124   :  { %792 = vmatprep.subr.bf16.mxu0 %v717_v33  ;;  %835 = vmatprep.subr.bf16.mxu1 %v719_v38  ;;  %v1604_v38 = vpack.c.bf16 %v1602_v60, %v1603_v34 }
 0x125   :  { %v1403_v40 = vpop.f32.mrf.mxu0  ;;  %v1411_v30 = vpop.f32.mrf.mxu1 }
 0x126   :  { %1589 = vst [vmem:[#allocation24_spill] sm:$0xff] %v1411_v30 }
 0x127   :  { %v1417_v26 = vpop.f32.mrf.mxu0  ;;  %793 = vmatpush1.bf16.msra.mxu0 %v716_v35  ;;  %v1421_v18 = vpop.f32.mrf.mxu1  ;;  %836 = vmatpush1.bf16.msra.mxu1 %v718_v29  ;;  %v1606_v29 = vld [vmem:[#allocation6_spill] sm:$0xff] }
 0x128   :  { %794 = vmatprep.subr.bf16.mxu0 %v713_v23  ;;  %837 = vmatprep.subr.bf16.mxu1 %v715_v32  ;;  %v1605_v23 = vld [vmem:[#allocation10_spill] sm:$0xff] }
 0x129   :  { %v1427_v15 = vpop.f32.mrf.mxu0  ;;  %v1433_v41 = vpop.f32.mrf.mxu1  ;;  %v1607_v32 = vpack.c.bf16 %v1605_v23, %v1606_v29 }
 0x12b   :  { %v1437_v43 = vpop.f32.mrf.mxu0  ;;  %795 = vmatpush1.bf16.msra.mxu0 %v712_v22  ;;  %v1439_v12 = vpop.f32.mrf.mxu1  ;;  %838 = vmatpush1.bf16.msra.mxu1 %v714_v36 }
 0x12c   :  { %796 = vmatprep.subr.bf16.mxu0 %v709_v19  ;;  %839 = vmatprep.subr.bf16.mxu1 %v711_v42 }
 0x12d   :  { %v1443_v6 = vpop.f32.mrf.mxu0  ;;  %v1447_v13 = vpop.f32.mrf.mxu1 }
 0x12f   :  { %v1449_v17 = vpop.f32.mrf.mxu0  ;;  %797 = vmatpush1.bf16.msra.mxu0 %v708_v16  ;;  %v1451_v7 = vpop.f32.mrf.mxu1  ;;  %840 = vmatpush1.bf16.msra.mxu1 %v710_v10 }
 0x130   :  { %798 = vmatprep.subr.bf16.mxu0 %v1590_v11  ;;  %841 = vmatprep.subr.bf16.mxu1 %v1591_v4 }
 0x131   :  { %v1459_v8 = vpop.f32.mrf.mxu0  ;;  %v1461_v20 = vpop.f32.mrf.mxu1 }
 0x133   :  { %v1463_v5 = vpop.f32.mrf.mxu0  ;;  %799 = vmatpush1.bf16.msra.mxu0 %v1592_v9  ;;  %v1468_v24 = vpop.f32.mrf.mxu1  ;;  %842 = vmatpush1.bf16.msra.mxu1 %v1595_v58 }
 0x134   :  { %800 = vmatprep.subr.bf16.mxu0 %v1598_v59  ;;  %843 = vmatprep.subr.bf16.mxu1 %v1601_v51 }
 0x135   :  { %v1479_v54 = vpop.f32.mrf.mxu0  ;;  %v1481_v33 = vpop.f32.mrf.mxu1 }
 0x137   :  { %v1483_v56 = vpop.f32.mrf.mxu0  ;;  %801 = vmatpush1.bf16.msra.mxu0 %v1604_v38  ;;  %v1488_v35 = vpop.f32.mrf.mxu1  ;;  %844 = vmatpush1.bf16.msra.mxu1 %v1607_v32 }
 0x139   :  { %v1493_v22 = vpop.f32.mrf.mxu0  ;;  %v1495_v19 = vpop.f32.mrf.mxu1 }
 0x13b   :  { %v468_v36 = vpop.f32.mrf.mxu0  ;;  %v661_v42 = vpop.f32.mrf.mxu1 }
 0x13d   :  { %v470_v16 = vpop.f32.mrf.mxu0  ;;  %v663_v10 = vpop.f32.mrf.mxu1 }
 0x13f   :  { %v472_v11 = vpop.f32.mrf.mxu0  ;;  %v665_v4 = vpop.f32.mrf.mxu1 }
 0x141   :  { %v476_v9 = vpop.f32.mrf.mxu0  ;;  %v669_v27 = vpop.f32.mrf.mxu1 }
 0x143   :  { %v478_v55 = vpop.f32.mrf.mxu0  ;;  %v671_v58 = vpop.f32.mrf.mxu1 }
 0x145   :  { %v480_v0 = vpop.f32.mrf.mxu0  ;;  %v673_v45 = vpop.f32.mrf.mxu1 }
 0x147   :  { %v482_v59 = vpop.f32.mrf.mxu0  ;;  %v675_v2 = vpop.f32.mrf.mxu1 }
 0x148   :  { %v753_v50 = vpack.c.bf16 %v482_v59, %v478_v55  ;;  %v755_v30 = vpack.c.bf16 %v675_v2, %v671_v58 }
 0x149   :  { %v486_v53 = vpop.f32.mrf.mxu0  ;;  %v679_v51 = vpop.f32.mrf.mxu1 }
 0x14b   :  { %v488_v60 = vpop.f32.mrf.mxu0  ;;  %v681_v34 = vpop.f32.mrf.mxu1 }
 0x14d   :  { %v490_v38 = vpop.f32.mrf.mxu0  ;;  %v683_v23 = vpop.f32.mrf.mxu1 }
 0x14e   :  { %v756_v57 = vpack.c.bf16 %v490_v38, %v486_v53  ;;  %v758_v37 = vpack.c.bf16 %v683_v23, %v679_v51 }
 0x14f   :  { %v492_v29 = vpop.f32.mrf.mxu0  ;;  %v685_v32 = vpop.f32.mrf.mxu1 }
 0x150   :  { %v757_v49 = vpack.c.bf16 %v492_v29, %v488_v60  ;;  %v759_v52 = vpack.c.bf16 %v685_v32, %v681_v34 }
 0x151   :  { %v496_v44 = vpop.f32.mrf.mxu0  ;;  %v689_v61 = vpop.f32.mrf.mxu1 }
 0x153   :  { %v498_v1 = vpop.f32.mrf.mxu0  ;;  %v691_v47 = vpop.f32.mrf.mxu1 }
 0x155   :  { %v500_v21 = vpop.f32.mrf.mxu0  ;;  %v693_v25 = vpop.f32.mrf.mxu1 }
 0x156   :  { %v760_v63 = vpack.c.bf16 %v500_v21, %v496_v44  ;;  %v762_v62 = vpack.c.bf16 %v693_v25, %v689_v61  ;;  %v749_v44 = vpack.c.bf16 %v472_v11, %v468_v36  ;;  %v744_v61 = vpack.c.bf16 %v1479_v54, %v1459_v8 }
 0x157   :  { %v502_v28 = vpop.f32.mrf.mxu0  ;;  %v695_v46 = vpop.f32.mrf.mxu1  ;;  %v742_v25 = vpack.c.bf16 %v1447_v13, %v1433_v41  ;;  %v1609_v21 = vpack.c.bf16 %v1421_v18, %v1399_v31  ;;  %v1615_v41 = vld [vmem:[#allocation17_spill] sm:$0xff]  ;;  %v1617_v13 = vld [vmem:[#allocation22_spill] sm:$0xff]  ;;  %v1621_v18 = vld [vmem:[#allocation15_spill] sm:$0xff] }
 0x158   :  { %v761_v14 = vpack.c.bf16 %v502_v28, %v498_v1  ;;  %v763_v48 = vpack.c.bf16 %v695_v46, %v691_v47  ;;  %v752_v1 = vpack.c.bf16 %v480_v0, %v476_v9  ;;  %v754_v46 = vpack.c.bf16 %v673_v45, %v669_v27  ;;  %v1611_v28 = vld [vmem:[#allocation24_spill] sm:$0xff]  ;;  %v1026_v31 = vld [vmem:[%s1547_s2] ss:$8 sps:$4 sm:$0xff]   ;;  %s1053_s2 = smov [#allocation2]  }
 0x159   :  { %v751_v47 = vpack.c.bf16 %v665_v4, %v661_v42  ;;  %s893_s13 = sshll.u32 %s1053_s2, 4  ;;  %s894_s13 = int_to_ptr.vmem [resolvable:$true] %s893_s13 }
 0x15a   :  { %802 = vmatprep.subr.bf16.mxu0 %v761_v14  ;;  %845 = vmatprep.subr.bf16.mxu1 %v763_v48  ;;  %v748_v48 = vpack.c.bf16 %v470_v16, %v1493_v22  ;;  %v1610_v14 = vpack.c.bf16 %v1403_v40, %v1388_v3  ;;  %v1623_v40 = vld [vmem:[#allocation20_spill] sm:$0xff]  ;;  %s1029_s14 = scalar_lea.vmem %s894_s13, 1024  ;;  %p1034_p1 = scmp.lt.s32.totalorder %s894_s13, %s894_s13 }
 0x15b   :  { %803 = vmatpush2.bf16.msra.mxu0 %v760_v63  ;;  %846 = vmatpush2.bf16.msra.mxu1 %v762_v62  ;;  %v745_v62 = vpack.c.bf16 %v1483_v56, %v1463_v5  ;;  %v741_v63 = vpack.c.bf16 %v1449_v17, %v1437_v43  ;;  %v1618_v17 = vld [vmem:[#allocation18_spill] sm:$0xff]  ;;  %p1030_p0 = scmp.ne.s32.totalorder %s894_s13, %s1029_s14  ;;  %p1035_p2 = scmp.lt.s32.totalorder %s1029_s14, %s1029_s14 }
 0x15c   :  { %804 = vmatprep.subr.bf16.mxu0 %v757_v49  ;;  %847 = vmatprep.subr.bf16.mxu1 %v759_v52  ;;  %v750_v49 = vpack.c.bf16 %v663_v10, %v1495_v19  ;;  %v743_v52 = vpack.c.bf16 %v1451_v7, %v1439_v12  ;;  %v1614_v12 = vld [vmem:[#allocation21_spill] sm:$0xff]  ;;  %v1624_v7 = vld [vmem:[#allocation16_spill] sm:$0xff] }
 0x15d   :  { %v1625_v8 = vpack.c.bf16 %v1623_v40, %v1624_v7  ;;  %p1036_p3 = por %p1035_p2, %p1034_p1 }
 0x15f   :  { %805 = vmatpush2.bf16.msra.mxu0 %v756_v57  ;;  %848 = vmatpush2.bf16.msra.mxu1 %v758_v37  ;;  %v747_v57 = vpack.c.bf16 %v1488_v35, %v1468_v24  ;;  %v740_v37 = vpack.c.bf16 %v1443_v6, %v1427_v15  ;;  %v1612_v15 = vld [vmem:[#allocation23_spill] sm:$0xff]  ;;  %v1616_v6 = vpack.c.bf16 %v1614_v12, %v1615_v41  ;;  %p1037_p4 = pnand %p1036_p3, %p1030_p0 }
 0x160   :  { %806 = vmatprep.subr.bf16.mxu0 %v753_v50  ;;  %849 = vmatprep.subr.bf16.mxu1 %v755_v30  ;;  %v746_v50 = vpack.c.bf16 %v1481_v33, %v1461_v20  ;;  %v1608_v30 = vpack.c.bf16 %v1417_v26, %v1397_v39  ;;  %v1613_v43 = vpack.c.bf16 %v1611_v28, %v1612_v15  ;;  %v1620_v26 = vld [vmem:[#allocation19_spill] sm:$0xff]  ;;  %v769_v20 = vpop.permute.xlu0 %768 }
 0x161   :  { %v1619_v39 = vpack.c.bf16 %v1617_v13, %v1618_v17  ;;  %v1622_v3 = vpack.c.bf16 %v1620_v26, %v1621_v18 }
 0x163   :  { %807 = vmatpush2.bf16.msra.mxu0 %v752_v1  ;;  %850 = vmatpush2.bf16.msra.mxu1 %v754_v46 }
 0x164   :  { %808 = vmatprep.subr.bf16.mxu0 %v749_v44  ;;  %851 = vmatprep.subr.bf16.mxu1 %v751_v47  ;;  %v774_v10 = vpop.permute.xlu0 %773 }
 0x167   :  { %809 = vmatpush2.bf16.msra.mxu0 %v748_v48  ;;  %852 = vmatpush2.bf16.msra.mxu1 %v750_v49 }
 0x168   :  { %810 = vmatprep.subr.bf16.mxu0 %v745_v62  ;;  %853 = vmatprep.subr.bf16.mxu1 %v747_v57 }
 0x16b   :  { %811 = vmatpush2.bf16.msra.mxu0 %v744_v61  ;;  %854 = vmatpush2.bf16.msra.mxu1 %v746_v50 }
 0x16c   :  { %812 = vmatprep.subr.bf16.mxu0 %v741_v63  ;;  %855 = vmatprep.subr.bf16.mxu1 %v743_v52 }
 0x16f   :  { %813 = vmatpush2.bf16.msra.mxu0 %v740_v37  ;;  %856 = vmatpush2.bf16.msra.mxu1 %v742_v25 }
 0x170   :  { %814 = vmatprep.subr.bf16.mxu0 %v1608_v30  ;;  %857 = vmatprep.subr.bf16.mxu1 %v1609_v21 }
 0x173   :  { %815 = vmatpush2.bf16.msra.mxu0 %v1610_v14  ;;  %858 = vmatpush2.bf16.msra.mxu1 %v1613_v43 }
 0x174   :  { %816 = vmatprep.subr.bf16.mxu0 %v1616_v6  ;;  %859 = vmatprep.subr.bf16.mxu1 %v1619_v39 }
 0x177   :  { %817 = vmatpush2.bf16.msra.mxu0 %v1622_v3  ;;  %860 = vmatpush2.bf16.msra.mxu1 %v1625_v8 }
 0x17a   :  { %819 = vmatmul.mubr.bf16.vlgmr.msra.gmra.mxu0 %v1026_v31  ;;  %862 = vmatmul.mubr.bf16.vlgmr.msra.gmra.mxu1 %v1026_v31 }
 0x23a   :  { %v820_v5 = vpop.f32.mrf.mxu0  ;;  %v863_v24 = vpop.f32.mrf.mxu1 }
 0x23b   :  { %v821_v54 = vadd.f32 %v820_v5, %v769_v20  ;;  %v864_v33 = vadd.f32 %v863_v24, %v769_v20 }
 0x23c   :  { %v822_v56 = vpop.f32.mrf.mxu0  ;;  %v865_v19 = vpop.f32.mrf.mxu1 }
 0x23d   :  { %v872_v35 = vmax.f32 %v821_v54, 0.0  ;;  %v823_v22 = vadd.f32 %v822_v56, %v769_v20  ;;  %v874_v36 = vmax.f32 %v864_v33, 0.0  ;;  %v866_v42 = vadd.f32 %v865_v19, %v769_v20 }
 0x23e   :  { %v824_v16 = vpop.f32.mrf.mxu0  ;;  %v867_v4 = vpop.f32.mrf.mxu1 }
 0x23f   :  { %880 = vst [vmem:[#allocation2] sm:$0xff] %v872_v35  ;;  %v873_v11 = vmax.f32 %v823_v22, 0.0  ;;  %v825_v9 = vadd.f32 %v824_v16, %v774_v10  ;;  %882 = vst [vmem:[#allocation2 + $0x10] sm:$0xff] %v874_v36  ;;  %v875_v27 = vmax.f32 %v866_v42, 0.0  ;;  %v868_v55 = vadd.f32 %v867_v4, %v774_v10 }
 0x240   :  { %v826_v58 = vpop.f32.mrf.mxu0  ;;  %v869_v59 = vpop.f32.mrf.mxu1 }
 0x241   :  { %881 = vst [vmem:[#allocation2 + $0x8] sm:$0xff] %v873_v11  ;;  %v876_v0 = vmax.f32 %v825_v9, 0.0  ;;  %v827_v45 = vadd.f32 %v826_v58, %v774_v10  ;;  %883 = vst [vmem:[#allocation2 + $0x18] sm:$0xff] %v875_v27  ;;  %v878_v2 = vmax.f32 %v868_v55, 0.0  ;;  %v870_v53 = vadd.f32 %v869_v59, %v774_v10 }
 0x243   :  { %884 = vst [vmem:[#allocation2 + $0x20] sm:$0xff] %v876_v0  ;;  %v877_v51 = vmax.f32 %v827_v45, 0.0  ;;  %886 = vst [vmem:[#allocation2 + $0x30] sm:$0xff] %v878_v2  ;;  %v879_v60 = vmax.f32 %v870_v53, 0.0 }
 0x245   :  { %885 = vst [vmem:[#allocation2 + $0x28] sm:$0xff] %v877_v51  ;;  %887 = vst [vmem:[#allocation2 + $0x38] sm:$0xff] %v879_v60 }
 0x246   :  { %1040 = shalt.err (!%p1037_p4)
}
 0x247   :  { %s1054_s15 = smov 512   ;;  %s1055_s16 = smov 32  }
 0x248   :  { %899 = dma.vmem_to_hbm [thread:$0]  %s894_s13, 1024, %s1549_s4, [#allocation3], %s1054_s15, %s1054_s15, %s1055_s16  }
 0x249   :  { %1049 = dma.done.wait [#allocation3], 1024  }
 0x24a   :  { %1050 = vsyncadd [#allocation3], 4294966272 }
 0x24b   :  { %903 = vsyncpa [#allocation3], 1 }

</bundles_post_ra>
